<compile_context>
chip_gen: v7x
topology: tpu7x:2x2x1
jax: 0.10.0
libtpu: 0.0.40
codegen_flags: <defaults>
</compile_context>

<pallas_src>
import jax
import jax.numpy as jnp
from jax import lax
from jax.experimental import pallas as pl
from jax.experimental.pallas import tpu as pltpu


def _make_ce_kernel(row_block, n_rows, faithful_eps):
    def kernel(x_ref, y_ref, o_ref):
        i = pl.program_id(0)

        x = x_ref[...].astype(jnp.float32)
        y = y_ref[...].astype(jnp.float32)

        # Numerically-stable log-softmax pieces (class axis = lanes).
        m = jnp.max(x, axis=-1, keepdims=True)            # (rb, 1)
        xm = x - m
        e = jnp.exp(xm)                                   # only full-tile transcendental
        denom = jnp.sum(e, axis=-1, keepdims=True)        # (rb, 1)

        if faithful_eps:
            # Exact reference semantics: log(P + eps) = log(e + eps*denom) - log(denom)
            # (divide-free, but keeps one extra full-tile log).
            logp = jnp.log(e + 1e-7 * denom) - jnp.log(denom)
            per_row = -jnp.sum(y * logp, axis=-1, keepdims=True)
        else:
            # log softmax = xm - log(denom);  loss_row = sum(y)*lse - sum(y*xm)
            lse = jnp.log(denom)                          # per-row log only
            per_row = (jnp.sum(y, axis=-1, keepdims=True) * lse
                       - jnp.sum(y * xm, axis=-1, keepdims=True))

        if n_rows % row_block != 0:
            # Mask rows of the (partial) tail tile.
            row_ids = i * row_block + lax.broadcasted_iota(
                jnp.int32, per_row.shape, 0)
            per_row = jnp.where(row_ids < n_rows, per_row, 0.0)

        # One partial sum per grid step (no cross-step RMW on a shared scalar).
        o_ref[0, 0] = jnp.sum(per_row)

    return kernel


def _auto_row_block(n_rows, n_cols, x_itemsize, y_itemsize,
                    stream_budget_bytes=16 * 1024 * 1024, max_rows=4096):
    """Largest row tile whose double-buffered x/y streams fit the VMEM budget."""
    bytes_per_row_in_flight = 2 * n_cols * (x_itemsize + y_itemsize)  # 2 = double-buffer
    rb = stream_budget_bytes // max(bytes_per_row_in_flight, 1)
    rb = min(rb, max_rows, max(n_rows, 8))
    rb = max(8, (rb // 8) * 8)   # sublane-aligned
    return int(rb)


def onehot_cross_entropy(x, y, *, row_block=None, faithful_eps=False):
    """Pallas implementation of OneHot_CrossEntropy.forward(x, y).

    x, y: same shape, softmax over the last axis; all leading axes are
    flattened into rows.  Returns a f32 scalar.
    """
    assert x.shape == y.shape, "input and target must have identical shapes"
    n_cols = x.shape[-1]
    x2 = x.reshape(-1, n_cols)
    y2 = y.reshape(-1, n_cols)
    n_rows = x2.shape[0]

    if row_block is None:
        row_block = _auto_row_block(n_rows, n_cols,
                                    x2.dtype.itemsize, y2.dtype.itemsize)
    num_blocks = pl.cdiv(n_rows, row_block)

    partials = pl.pallas_call(
        _make_ce_kernel(row_block, n_rows, faithful_eps),
        out_shape=jax.ShapeDtypeStruct((num_blocks, 1), jnp.float32),
        grid_spec=pltpu.PrefetchScalarGridSpec(
            num_scalar_prefetch=0,
            grid=(num_blocks,),
            in_specs=[
                pl.BlockSpec((row_block, n_cols), lambda i: (i, 0)),
                pl.BlockSpec((row_block, n_cols), lambda i: (i, 0)),
            ],
            # Disjoint per-block partial sums -> no accumulator carried across
            # the grid, so the row axis can be "parallel" (v7x megacore).
            out_specs=pl.BlockSpec((1, 1), lambda i: (i, 0),
                                   memory_space=pltpu.SMEM),
        ),
        compiler_params=pltpu.CompilerParams(
            dimension_semantics=("parallel",),
            vmem_limit_bytes=48 * 1024 * 1024,  # safe on v5e/v6e (128 MiB) and v7x (64 MiB)
        ),
    )(x2, y2)

    return jnp.sum(partials)


if __name__ == "__main__":
    key = jax.random.PRNGKey(0)
    kx, ky = jax.random.split(key)

    # Small shapes consistent with the module: (batch, seq, classes), softmax
    # over the last (class) axis.
    B, S, C = 4, 8, 128
    x = jax.random.normal(kx, (B, S, C), dtype=jnp.float32)
    labels = jax.random.randint(ky, (B, S), 0, C)
    y = jax.nn.one_hot(labels, C, dtype=jnp.float32)

    # PyTorch-faithful reference: -sum(y * log(softmax(x) + 1e-7)).
    p_ref = jax.nn.softmax(x, axis=-1)
    ref = -jnp.sum(y * jnp.log(p_ref + 1e-7))

    # Fast (default, log-sum-exp) path: identical quantity minus the 1e-7
    # guard; allow the documented tiny divergence.
    loss = jax.jit(onehot_cross_entropy)(x, y)
    jax.block_until_ready(loss)
    assert jnp.allclose(loss, ref, rtol=1e-4, atol=2e-2), (loss, ref)

    # Epsilon-faithful path: must match the reference tightly.
    loss_eps = jax.jit(
        lambda a, b: onehot_cross_entropy(a, b, faithful_eps=True))(x, y)
    jax.block_until_ready(loss_eps)
    assert jnp.allclose(loss_eps, ref, rtol=1e-5, atol=1e-3), (loss_eps, ref)

    # Ragged row count (21 rows, row_block=16): exercises the tail-mask path.
    x3 = jax.random.normal(kx, (3, 7, C), dtype=jnp.float32)
    lab3 = jax.random.randint(ky, (3, 7), 0, C)
    y3 = jax.nn.one_hot(lab3, C, dtype=jnp.float32)
    loss3 = jax.jit(
        lambda a, b: onehot_cross_entropy(a, b, row_block=16))(x3, y3)
    jax.block_until_ready(loss3)
    ref3 = -jnp.sum(y3 * jnp.log(jax.nn.softmax(x3, axis=-1) + 1e-7))
    assert jnp.allclose(loss3, ref3, rtol=1e-4, atol=2e-2), (loss3, ref3)

    print("KERNEL_OK")
</pallas_src>

<mosaic_0001>
module attributes {stable_mosaic.version = 11 : i64} {
  func.func @kernel(%arg0: i32, %arg1: memref<32x128xf32, #tpu.memory_space<vmem>>, %arg2: memref<32x128xf32, #tpu.memory_space<vmem>>, %arg3: memref<1x1xf32, #tpu.memory_space<smem>>) attributes {dimension_semantics = [#tpu.dimension_semantics<parallel>], iteration_bounds = array<i64: 1>, scalar_prefetch = 0 : i64, scratch_operands = 0 : i64, tpu.core_type = #tpu.core_type<tc>, window_params = [{transform_indices = @transform_0, window_bounds = array<i64: 32, 128>}, {transform_indices = @transform_1, window_bounds = array<i64: 32, 128>}, {transform_indices = @transform_2, window_bounds = array<i64: 1, 1>}]} {
    %c0 = arith.constant 0 : index
    %c0_0 = arith.constant 0 : index
    %0 = vector.load %arg1[%c0, %c0_0] : memref<32x128xf32, #tpu.memory_space<vmem>>, vector<32x128xf32>
    %c0_1 = arith.constant 0 : index
    %c0_2 = arith.constant 0 : index
    %1 = vector.load %arg2[%c0_1, %c0_2] : memref<32x128xf32, #tpu.memory_space<vmem>>, vector<32x128xf32>
    %cst = arith.constant dense<0xFF800000> : vector<32xf32>
    %2 = vector.multi_reduction <maximumf>, %0, %cst [1] : vector<32x128xf32> to vector<32xf32>
    %3 = vector.shape_cast %2 : vector<32xf32> to vector<32x1xf32>
    %4 = vector.broadcast %3 : vector<32x1xf32> to vector<32x128xf32>
    %5 = arith.subf %0, %4 : vector<32x128xf32>
    %6 = math.exp %5 : vector<32x128xf32>
    %cst_3 = arith.constant dense<0.000000e+00> : vector<32xf32>
    %7 = vector.multi_reduction <add>, %6, %cst_3 [1] : vector<32x128xf32> to vector<32xf32>
    %8 = vector.shape_cast %7 : vector<32xf32> to vector<32x1xf32>
    %9 = math.log %8 : vector<32x1xf32>
    %cst_4 = arith.constant dense<0.000000e+00> : vector<32xf32>
    %10 = vector.multi_reduction <add>, %1, %cst_4 [1] : vector<32x128xf32> to vector<32xf32>
    %11 = vector.shape_cast %10 : vector<32xf32> to vector<32x1xf32>
    %12 = arith.mulf %11, %9 : vector<32x1xf32>
    %13 = arith.mulf %1, %5 : vector<32x128xf32>
    %cst_5 = arith.constant dense<0.000000e+00> : vector<32xf32>
    %14 = vector.multi_reduction <add>, %13, %cst_5 [1] : vector<32x128xf32> to vector<32xf32>
    %15 = vector.shape_cast %14 : vector<32xf32> to vector<32x1xf32>
    %16 = arith.subf %12, %15 : vector<32x1xf32>
    %17 = vector.shape_cast %16 : vector<32x1xf32> to vector<1x32x1xf32>
    %cst_6 = arith.constant dense<0.000000e+00> : vector<1xf32>
    %18 = vector.multi_reduction <add>, %17, %cst_6 [1, 2] : vector<1x32x1xf32> to vector<1xf32>
    %19 = vector.shape_cast %18 : vector<1xf32> to vector<1x1x1xf32>
    %20 = vector.extract %19[0, 0, 0] : f32 from vector<1x1x1xf32>
    %c0_7 = arith.constant 0 : index
    %c0_8 = arith.constant 0 : index
    %21 = memref.load %arg3[%c0_7, %c0_8] : memref<1x1xf32, #tpu.memory_space<smem>>
    memref.store %20, %arg3[%c0_7, %c0_8] : memref<1x1xf32, #tpu.memory_space<smem>>
    return
  }
  func.func @transform_0(%arg0: i32) -> (i32, i32) {
    %c0_i32 = arith.constant 0 : i32
    %c0_i32_0 = arith.constant 0 : i32
    return %arg0, %c0_i32 : i32, i32
  }
  func.func @transform_1(%arg0: i32) -> (i32, i32) {
    %c0_i32 = arith.constant 0 : i32
    %c0_i32_0 = arith.constant 0 : i32
    return %arg0, %c0_i32 : i32, i32
  }
  func.func @transform_2(%arg0: i32) -> (i32, i32) {
    %c0_i32 = arith.constant 0 : i32
    %c0_i32_0 = arith.constant 0 : i32
    return %arg0, %c0_i32 : i32, i32
  }
}

</mosaic_0001>

<bundles_post_ra>
// kernel: onehot_cross_entropy.1
= control target key start
LH: loop header
LB: loop body
LE: loop exit
PB: predicated region body
PF: predicated region fallthrough
CT: control target
= control target key end

     0   :  { %7 = vsyncpa [#allocation3], 0  ;;  %s285_s0 = inlined_call_operand.hbm [shape: f32[32,128], index: 0, kind: input, shape index: {}]   ;;  %s286_s1 = inlined_call_operand.hbm [shape: f32[32,128], index: 1, kind: input, shape index: {}]   ;;  %s287_s2 = inlined_call_operand.hbm [shape: f32[1,1], index: 2, kind: output, shape index: {}]  }
   0x1   :  { %8 = vsyncpa [#allocation6], 0 }
   0x2   :  { %9 = vsyncpa [#allocation4], 0  ;;  %s229_s9 = smov [#allocation2]   ;;  %s169_s13 = scalar_lea.hbm %s285_s0, 512 }
   0x3   :  { %s15_s10 = sshll.u32 %s229_s9, 4  ;;  %p170_p0 = scmp.ne.s32.totalorder %s285_s0, %s169_s13  ;;  %s16_s10 = int_to_ptr.vmem [resolvable:$true] %s15_s10 }
   0x4   :  { %p173_p1 = scmp.lt.u32.totalorder %s169_s13, %s285_s0 }
   0x6   :  { %p175_p2 = pnand %p173_p1, %p170_p0 }
   0x8   :  { %178 = shalt.err (!%p175_p2)
}
   0x9   :  { %s179_s18 = scalar_lea.vmem %s16_s10, 512  ;;  %p184_p4 = scmp.lt.s32.totalorder %s16_s10, %s16_s10 }
   0xa   :  { %p180_p3 = scmp.ne.s32.totalorder %s16_s10, %s179_s18  ;;  %p185_p5 = scmp.lt.s32.totalorder %s179_s18, %s179_s18 }
   0xc   :  { %p186_p6 = por %p185_p5, %p184_p4 }
   0xe   :  { %p187_p7 = pnand %p186_p6, %p180_p3 }
  0x10   :  { %190 = shalt.err (!%p187_p7)
}
  0x11   :  { %s230_s19 = smov 128   ;;  %s231_s20 = smov 8  }
  0x12   :  { %21 = dma.hbm_to_vmem [thread:$0]  %s285_s0, 512, %s16_s10, [#allocation3], %s230_s19, %s230_s19, %s231_s20  }
  0x13   :  { %s232_s23 = smov [#allocation5]   ;;  %s191_s27 = scalar_lea.hbm %s286_s1, 512 }
  0x14   :  { %s27_s24 = sshll.u32 %s232_s23, 4  ;;  %p192_p8 = scmp.ne.s32.totalorder %s286_s1, %s191_s27  ;;  %s28_s24 = int_to_ptr.vmem [resolvable:$true] %s27_s24 }
  0x15   :  { %p195_p9 = scmp.lt.u32.totalorder %s191_s27, %s286_s1 }
  0x17   :  { %p197_p10 = pnand %p195_p9, %p192_p8 }
  0x19   :  { %200 = shalt.err (!%p197_p10)
}
  0x1a   :  { %s201_s4 = scalar_lea.vmem %s28_s24, 512  ;;  %p206_p12 = scmp.lt.s32.totalorder %s28_s24, %s28_s24 }
  0x1b   :  { %p202_p11 = scmp.ne.s32.totalorder %s28_s24, %s201_s4  ;;  %p207_p13 = scmp.lt.s32.totalorder %s201_s4, %s201_s4 }
  0x1d   :  { %p208_p0 = por %p207_p13, %p206_p12 }
  0x1f   :  { %p209_p1 = pnand %p208_p0, %p202_p11 }
  0x21   :  { %212 = shalt.err (!%p209_p1)
}
  0x22   :  { %33 = dma.hbm_to_vmem [thread:$0]  %s286_s1, 512, %s28_s24, [#allocation6], %s230_s19, %s230_s19, %s231_s20  }
  0x23   :  { %223 = dma.done.wait [#allocation3], 512  }
  0x24   :  { %224 = vsyncadd [#allocation3], 4294966784 }
  0x25   :  { %225 = dma.done.wait [#allocation6], 512  }
  0x26   :  { %226 = vsyncadd [#allocation6], 4294966784  ;;  %v40_v0 = vld [vmem:[#allocation2] sm:$0xff]  ;;  %v42_v1 = vld [vmem:[#allocation2 + $0x10] sm:$0xff]  ;;  %vm112_vm0 = vcmask 7168   ;;  %s213_s8 = scalar_lea.hbm %s287_s2, 16 }
  0x27   :  { %48 = vmax.xlane.f32.xlu0 %v40_v0  ;;  %52 = vmax.xlane.f32.xlu1 %v42_v1  ;;  %v41_v2 = vld [vmem:[#allocation2 + $0x8] sm:$0xff]  ;;  %v43_v3 = vld [vmem:[#allocation2 + $0x18] sm:$0xff]  ;;  %v44_v20 = vld [vmem:[#allocation5] sm:$0xff]  ;;  %p214_p2 = scmp.ne.s32.totalorder %s287_s2, %s213_s8  ;;  %p217_p3 = scmp.lt.u32.totalorder %s213_s8, %s287_s2 }
  0x28   :  { %v46_v21 = vld [vmem:[#allocation5 + $0x10] sm:$0xff]  ;;  %v45_v22 = vld [vmem:[#allocation5 + $0x8] sm:$0xff]  ;;  %v47_v26 = vld [vmem:[#allocation5 + $0x18] sm:$0xff] }
  0x29   :  { %p219_p4 = pnand %p217_p3, %p214_p2 }
  0x2b   :  { %50 = vmax.xlane.f32.xlu0 %v41_v2  ;;  %54 = vmax.xlane.f32.xlu1 %v43_v3 }
  0xb4   :  { %v49_v4 = vpop.xlane.xlu0 %48  ;;  %v53_v5 = vpop.xlane.xlu1 %52 }
  0xb5   :  { %v56_v6 = vsub.f32 %v40_v0, %v49_v4  ;;  %v58_v7 = vsub.f32 %v42_v1, %v53_v5 }
  0xb7   :  { %v60_v8 = vmul.f32 1.442695, %v56_v6  ;;  %v64_v9 = vmul.f32 1.442695, %v58_v7  ;;  %v96_v24 = vmul.f32 %v56_v6, %v44_v20  ;;  %v98_v25 = vmul.f32 %v58_v7, %v46_v21 }
  0xb8   :  { %v51_v10 = vpop.xlane.xlu0 %50  ;;  %v55_v11 = vpop.xlane.xlu1 %54 }
  0xb9   :  { %153 = vpow2.f32 %v60_v8  ;;  %v57_v12 = vsub.f32 %v41_v2, %v51_v10  ;;  %v59_v13 = vsub.f32 %v43_v3, %v55_v11 }
  0xba   :  { %155 = vpow2.f32 %v64_v9 }
  0xbb   :  { %v62_v14 = vmul.f32 1.442695, %v57_v12  ;;  %v66_v15 = vmul.f32 1.442695, %v59_v13  ;;  %v97_v23 = vmul.f32 %v57_v12, %v45_v22  ;;  %v99_v27 = vmul.f32 %v59_v13, %v47_v26 }
  0xbd   :  { %157 = vpow2.f32 %v62_v14 }
  0xbe   :  { %159 = vpow2.f32 %v66_v15 }
  0xc3   :  { %v154_v16 = vpop.eup %153 }
  0xc4   :  { %68 = vadd.xlane.f32.xlu0 %v154_v16  ;;  %v156_v17 = vpop.eup %155 }
  0xc7   :  { %v158_v18 = vpop.eup %157 }
  0xc8   :  { %72 = vadd.xlane.f32.xlu0 %v156_v17  ;;  %70 = vadd.xlane.f32.xlu1 %v158_v18  ;;  %v160_v19 = vpop.eup %159 }
  0xcc   :  { %84 = vadd.xlane.f32.xlu0 %v44_v20  ;;  %74 = vadd.xlane.f32.xlu1 %v160_v19 }
  0xd0   :  { %88 = vadd.xlane.f32.xlu0 %v46_v21  ;;  %86 = vadd.xlane.f32.xlu1 %v45_v22 }
  0xd4   :  { %102 = vadd.xlane.f32.xlu0 %v97_v23  ;;  %100 = vadd.xlane.f32.xlu1 %v96_v24 }
  0xd8   :  { %104 = vadd.xlane.f32.xlu0 %v98_v25  ;;  %90 = vadd.xlane.f32.xlu1 %v47_v26 }
  0xdc   :  { %106 = vadd.xlane.f32.xlu1 %v99_v27 }
 0x151   :  { %v69_v28 = vpop.xlane.xlu0 %68 }
 0x152   :  { %161 = vlog2.f32 %v69_v28 }
 0x155   :  { %v71_v29 = vpop.xlane.xlu1 %70  ;;  %v73_v30 = vpop.xlane.xlu0 %72 }
 0x156   :  { %163 = vlog2.f32 %v71_v29 }
 0x157   :  { %165 = vlog2.f32 %v73_v30 }
 0x159   :  { %v75_v31 = vpop.xlane.xlu1 %74  ;;  %v85_v32 = vpop.xlane.xlu0 %84 }
 0x15a   :  { %167 = vlog2.f32 %v75_v31 }
 0x15c   :  { %v162_v33 = vpop.eup %161 }
 0x15d   :  { %v77_v34 = vmul.f32 0.6931472, %v162_v33  ;;  %v87_v35 = vpop.xlane.xlu1 %86  ;;  %v89_v36 = vpop.xlane.xlu0 %88 }
 0x15f   :  { %v92_v37 = vmul.f32 %v85_v32, %v77_v34 }
 0x160   :  { %v164_v38 = vpop.eup %163 }
 0x161   :  { %v166_v39 = vpop.eup %165  ;;  %v79_v40 = vmul.f32 0.6931472, %v164_v38  ;;  %v101_v41 = vpop.xlane.xlu1 %100 }
 0x162   :  { %v103_v42 = vpop.xlane.xlu0 %102  ;;  %v81_v43 = vmul.f32 0.6931472, %v166_v39  ;;  %v108_v45 = vsub.f32 %v92_v37, %v101_v41 }
 0x163   :  { %v93_v44 = vmul.f32 %v87_v35, %v79_v40 }
 0x164   :  { %v168_v46 = vpop.eup %167  ;;  %v94_v47 = vmul.f32 %v89_v36, %v81_v43  ;;  %v113_v53 = vsel %vm112_vm0, %v108_v45, 0.0 }
 0x165   :  { %v109_v48 = vsub.f32 %v93_v44, %v103_v42  ;;  %v83_v49 = vmul.f32 0.6931472, %v168_v46  ;;  %v91_v50 = vpop.xlane.xlu1 %90 }
 0x166   :  { %v105_v51 = vpop.xlane.xlu0 %104 }
 0x167   :  { %v110_v52 = vsub.f32 %v94_v47, %v105_v51  ;;  %v114_v54 = vsel %vm112_vm0, %v109_v48, 0.0  ;;  %v95_v55 = vmul.f32 %v91_v50, %v83_v49 }
 0x168   :  { %v115_v56 = vadd.f32 %v114_v54, %v113_v53 }
 0x169   :  { %v116_v57 = vsel %vm112_vm0, %v110_v52, 0.0  ;;  %v107_v58 = vpop.xlane.xlu1 %106 }
 0x16a   :  { %v111_v59 = vsub.f32 %v95_v55, %v107_v58  ;;  %v117_v60 = vadd.f32 %v116_v57, %v115_v56 }
 0x16c   :  { %v118_v61 = vsel %vm112_vm0, %v111_v59, 0.0 }
 0x16d   :  { %v119_v62 = vadd.f32 %v118_v61, %v117_v60 }
 0x16f   :  { %120 = vadd.xlane.f32.xlu0 %v119_v62 }
 0x1fc   :  { %v121_v63 = vpop.xlane.xlu0 %120 }
 0x1fd   :  { %v122_v0 = vrot.slane %v121_v63, 4 }
 0x1ff   :  { %v123_v1 = vadd.f32 %v122_v0, %v121_v63 }
 0x201   :  { %v124_v2 = vrot.slane %v123_v1, 2 }
 0x203   :  { %v125_v3 = vadd.f32 %v124_v2, %v123_v1 }
 0x205   :  { %v126_v4 = vrot.slane %v125_v3, 1 }
 0x207   :  { %v127_v5 = vadd.f32 %v126_v4, %v125_v3 }
 0x209   :  { %146 = vpush %v127_v5 }
 0x23a   :  { %s147_s1 = spop %146 }
 0x23b   :  { %130 = sst [smem:[#allocation7]] %s147_s1 }
 0x23c   :  { %222 = shalt.err (!%p219_p4)
}
 0x23d   :  { %s233_s13 = smov [#allocation7]  }
 0x23e   :  { %138 = dma.smem_to_hbm %s233_s13, 16, %s287_s2, [#allocation4]  }
 0x23f   :  { %227 = dma.done.wait [#allocation4], 16  }
 0x240   :  { %228 = vsyncadd [#allocation4], 4294967280 }
 0x241   :  { %142 = sfence }
 0x242   :  { %143 = vsyncpa [#allocation3], 1 }
 0x243   :  { %144 = vsyncpa [#allocation6], 1 }
 0x244   :  { %145 = vsyncpa [#allocation4], 1 }

</bundles_post_ra>
